<compile_context>
chip_gen: v6e
topology: v6e:2x2x1
jax: 0.10.0
libtpu: 0.0.40
codegen_flags: <defaults>
</compile_context>

<pallas_src>
import functools

import jax
import jax.numpy as jnp
from jax import lax
from jax.experimental import pallas as pl
from jax.experimental.pallas import tpu as pltpu


def _attention_kernel(xq_ref, xkv_ref, wq_t_ref, wkv_t_ref, wproj_t_ref,
                      bproj_ref, o_ref, *, num_heads, head_dim):
    # xq_ref:      (1, Tq, C)  query-tile rows of x
    # xkv_ref:     (1, N,  C)  full sequence (source of K/V)
    # wq_t_ref:    (C, C)      Q weight, transposed, pre-scaled by head_dim**-0.5
    # wkv_t_ref:   (C, 2C)     [K; V] weights, transposed
    # wproj_t_ref: (C, C)
    # bproj_ref:   (1, C)
    # o_ref:       (1, Tq, C)
    xq = xq_ref[0]                                   # (Tq, C)
    xkv = xkv_ref[0]                                 # (N, C)
    c = num_heads * head_dim
    d = head_dim

    # Projections (scale already folded into wq_t; qkv_bias=False).
    q = jnp.dot(xq, wq_t_ref[...],
                preferred_element_type=jnp.float32)          # (Tq, C)
    kv = jnp.dot(xkv, wkv_t_ref[...],
                 preferred_element_type=jnp.float32)         # (N, 2C)

    # Per-head attention via static column slices — no (H, N, D) transposes.
    ctx_cols = []
    for h in range(num_heads):
        lo = h * d
        q_h = q[:, lo:lo + d]                        # (Tq, D)
        k_h = kv[:, lo:lo + d]                       # (N, D)
        v_h = kv[:, c + lo:c + lo + d]               # (N, D)

        # s = q_h @ k_h^T, contracting the head dim (no explicit transpose).
        s = lax.dot_general(q_h, k_h, (((1,), (1,)), ((), ())),
                            preferred_element_type=jnp.float32)   # (Tq, N)

        # Numerically stable softmax; reciprocal on the EUP slot.
        s = s - jnp.max(s, axis=-1, keepdims=True)
        p = jnp.exp(s)
        p = p * pl.reciprocal(jnp.sum(p, axis=-1, keepdims=True), approx=True)

        # attn_drop is identity (p = 0.0).
        ctx_cols.append(jnp.dot(p, v_h,
                                preferred_element_type=jnp.float32))  # (Tq, D)

    ctx = jnp.concatenate(ctx_cols, axis=-1)                 # (Tq, C)

    # Output projection (+bias). proj_drop is identity (p = 0.0).
    out = jnp.dot(ctx, wproj_t_ref[...],
                  preferred_element_type=jnp.float32) + bproj_ref[...]
    o_ref[0] = out.astype(o_ref.dtype)


def attention_pallas(x, wqkv, wproj, bproj, *, num_heads):
    """x: (B, N, C); wqkv: (3C, C); wproj: (C, C); bproj: (C,)."""
    B, N, C = x.shape
    head_dim = C // num_heads
    scale = head_dim ** (-0.5)

    # Split + transpose weights; fold the softmax scale into the Q weights
    # (exact since qkv_bias=False).
    wq_t = (wqkv[:C] * scale).T                  # (C, C)
    wkv_t = wqkv[C:].T                           # (C, 2C)  — [K; V]
    wproj_t = wproj.T                            # (C, C)
    bproj_2d = bproj.reshape(1, C)               # (1, C)

    # Query tiling: second grid axis for pipeline depth / megacore sharding.
    tile_q = 128 if (N % 128 == 0) else N
    num_q_tiles = N // tile_q

    kernel = functools.partial(
        _attention_kernel, num_heads=num_heads, head_dim=head_dim)

    # Advisory cost estimate (QKV proj + QK^T + PV + out proj; exp count).
    flops = 2 * B * (N * C * 3 * C + 2 * num_heads * N * N * head_dim + N * C * C)
    transcendentals = B * num_heads * N * N
    bytes_accessed = 4 * (2 * B * N * C + 3 * C * C + C * C + C)

    return pl.pallas_call(
        kernel,
        out_shape=jax.ShapeDtypeStruct((B, N, C), x.dtype),
        grid_spec=pltpu.PrefetchScalarGridSpec(
            num_scalar_prefetch=0,
            grid=(B, num_q_tiles),
            in_specs=[
                pl.BlockSpec((1, tile_q, C), lambda b, qi: (b, qi, 0)),  # x (Q rows)
                pl.BlockSpec((1, N, C), lambda b, qi: (b, 0, 0)),        # x (K/V rows)
                pl.BlockSpec((C, C), lambda b, qi: (0, 0)),              # Wq^T (scaled)
                pl.BlockSpec((C, 2 * C), lambda b, qi: (0, 0)),          # Wkv^T
                pl.BlockSpec((C, C), lambda b, qi: (0, 0)),              # Wproj^T
                pl.BlockSpec((1, C), lambda b, qi: (0, 0)),              # bias
            ],
            out_specs=pl.BlockSpec((1, tile_q, C), lambda b, qi: (b, qi, 0)),
        ),
        compiler_params=pltpu.CompilerParams(
            dimension_semantics=("parallel", "parallel")),
        cost_estimate=pl.CostEstimate(
            flops=flops,
            transcendentals=transcendentals,
            bytes_accessed=bytes_accessed),
    )(x, x, wq_t, wkv_t, wproj_t, bproj_2d)


def attention_reference(x, wqkv, wproj, bproj, *, num_heads):
    """Pure-JAX mirror of the PyTorch forward, for verification."""
    B, N, C = x.shape
    head_dim = C // num_heads
    scale = head_dim ** (-0.5)
    qkv = jnp.einsum('bnc,oc->bno', x, wqkv)                 # (B, N, 3C)
    qkv = qkv.reshape(B, N, 3, num_heads, head_dim).transpose(2, 0, 3, 1, 4)
    q, k, v = qkv[0], qkv[1], qkv[2]                         # (B, H, N, D)
    attn = jnp.einsum('bhnd,bhmd->bhnm', q, k) * scale
    attn = jax.nn.softmax(attn, axis=-1)
    out = jnp.einsum('bhnm,bhmd->bhnd', attn, v)             # (B, H, N, D)
    out = out.transpose(0, 2, 1, 3).reshape(B, N, C)
    out = jnp.einsum('bnc,oc->bno', out, wproj) + bproj
    return out


if __name__ == "__main__":
    # Small shapes consistent with the module: dim=32, num_heads=8 (head_dim=4).
    B, N, C = 2, 8, 32
    num_heads = 8

    key = jax.random.PRNGKey(0)
    kx, kqkv, kproj, kbias = jax.random.split(key, 4)

    x = jax.random.normal(kx, (B, N, C), dtype=jnp.float32)
    # nn.Linear-style parameter shapes, deterministic init.
    wqkv = jax.random.normal(kqkv, (3 * C, C), dtype=jnp.float32) * 0.05
    wproj = jax.random.normal(kproj, (C, C), dtype=jnp.float32) * 0.05
    bproj = jax.random.normal(kbias, (C,), dtype=jnp.float32) * 0.05

    out = attention_pallas(x, wqkv, wproj, bproj, num_heads=num_heads)
    out = jax.block_until_ready(out)

    ref = attention_reference(x, wqkv, wproj, bproj, num_heads=num_heads)
    assert out.shape == (B, N, C)
    # Slightly relaxed tolerance to cover pl.reciprocal(approx=True) in softmax.
    assert jnp.allclose(out, ref, atol=2e-3, rtol=2e-3), "mismatch vs reference"

    print("KERNEL_OK")
</pallas_src>

<mosaic_0001>
module attributes {stable_mosaic.version = 11 : i64} {
  func.func @_attention_kernel(%arg0: i32, %arg1: i32, %arg2: memref<1x8x32xf32, #tpu.memory_space<vmem>>, %arg3: memref<1x8x32xf32, #tpu.memory_space<vmem>>, %arg4: memref<32x32xf32, #tpu.memory_space<vmem>>, %arg5: memref<32x64xf32, #tpu.memory_space<vmem>>, %arg6: memref<32x32xf32, #tpu.memory_space<vmem>>, %arg7: memref<1x32xf32, #tpu.memory_space<vmem>>, %arg8: memref<1x8x32xf32, #tpu.memory_space<vmem>>) attributes {dimension_semantics = [#tpu.dimension_semantics<parallel>, #tpu.dimension_semantics<parallel>], iteration_bounds = array<i64: 2, 1>, scalar_prefetch = 0 : i64, scratch_operands = 0 : i64, tpu.core_type = #tpu.core_type<tc>, window_params = [{transform_indices = @transform_0, window_bounds = array<i64: 1, 8, 32>}, {transform_indices = @transform_1, window_bounds = array<i64: 1, 8, 32>}, {pipeline_mode = #tpu.pipeline_mode<synchronous>, transform_indices = @transform_2, window_bounds = array<i64: 32, 32>}, {pipeline_mode = #tpu.pipeline_mode<synchronous>, transform_indices = @transform_3, window_bounds = array<i64: 32, 64>}, {pipeline_mode = #tpu.pipeline_mode<synchronous>, transform_indices = @transform_4, window_bounds = array<i64: 32, 32>}, {pipeline_mode = #tpu.pipeline_mode<synchronous>, transform_indices = @transform_5, window_bounds = array<i64: 1, 32>}, {transform_indices = @transform_6, window_bounds = array<i64: 1, 8, 32>}]} {
    %c0 = arith.constant 0 : index
    %c0_0 = arith.constant 0 : index
    %c0_1 = arith.constant 0 : index
    %0 = vector.load %arg2[%c0, %c0_0, %c0_1] : memref<1x8x32xf32, #tpu.memory_space<vmem>>, vector<1x8x32xf32>
    %1 = vector.shape_cast %0 : vector<1x8x32xf32> to vector<8x32xf32>
    %c0_2 = arith.constant 0 : index
    %c0_3 = arith.constant 0 : index
    %c0_4 = arith.constant 0 : index
    %2 = vector.load %arg3[%c0_2, %c0_3, %c0_4] : memref<1x8x32xf32, #tpu.memory_space<vmem>>, vector<1x8x32xf32>
    %3 = vector.shape_cast %2 : vector<1x8x32xf32> to vector<8x32xf32>
    %c0_5 = arith.constant 0 : index
    %c0_6 = arith.constant 0 : index
    %4 = vector.load %arg4[%c0_5, %c0_6] : memref<32x32xf32, #tpu.memory_space<vmem>>, vector<32x32xf32>
    %cst = arith.constant dense<0.000000e+00> : vector<8x32xf32>
    %5 = tpu.matmul %1, %4, %cst {dimension_numbers = #tpu.dot_dimension_numbers<[1], [0], [0], [1], [0, 0, 1, 1], [], []>} : vector<8x32xf32>, vector<32x32xf32>, vector<8x32xf32> -> vector<8x32xf32>
    %c0_7 = arith.constant 0 : index
    %c0_8 = arith.constant 0 : index
    %6 = vector.load %arg5[%c0_7, %c0_8] : memref<32x64xf32, #tpu.memory_space<vmem>>, vector<32x64xf32>
    %cst_9 = arith.constant dense<0.000000e+00> : vector<8x64xf32>
    %7 = tpu.matmul %3, %6, %cst_9 {dimension_numbers = #tpu.dot_dimension_numbers<[1], [0], [0], [1], [0, 0, 1, 1], [], []>} : vector<8x32xf32>, vector<32x64xf32>, vector<8x64xf32> -> vector<8x64xf32>
    %8 = vector.extract_strided_slice %5 {offsets = [0, 0], sizes = [8, 4], strides = [1, 1]} : vector<8x32xf32> to vector<8x4xf32>
    %9 = vector.extract_strided_slice %7 {offsets = [0, 0], sizes = [8, 4], strides = [1, 1]} : vector<8x64xf32> to vector<8x4xf32>
    %10 = vector.extract_strided_slice %7 {offsets = [0, 32], sizes = [8, 4], strides = [1, 1]} : vector<8x64xf32> to vector<8x4xf32>
    %cst_10 = arith.constant dense<0.000000e+00> : vector<8x8xf32>
    %11 = tpu.matmul %8, %9, %cst_10 {dimension_numbers = #tpu.dot_dimension_numbers<[1], [1], [0], [0], [0, 0, 1, 0], [], []>} : vector<8x4xf32>, vector<8x4xf32>, vector<8x8xf32> -> vector<8x8xf32>
    %cst_11 = arith.constant dense<0xFF800000> : vector<8xf32>
    %12 = vector.multi_reduction <maximumf>, %11, %cst_11 [1] : vector<8x8xf32> to vector<8xf32>
    %13 = vector.shape_cast %12 : vector<8xf32> to vector<8x1xf32>
    %14 = vector.broadcast %13 : vector<8x1xf32> to vector<8x8xf32>
    %15 = arith.subf %11, %14 : vector<8x8xf32>
    %16 = math.exp %15 : vector<8x8xf32>
    %cst_12 = arith.constant dense<0.000000e+00> : vector<8xf32>
    %17 = vector.multi_reduction <add>, %16, %cst_12 [1] : vector<8x8xf32> to vector<8xf32>
    %18 = vector.shape_cast %17 : vector<8xf32> to vector<8x1xf32>
    %19 = tpu.reciprocal %18 {approx = true} : vector<8x1xf32> -> vector<8x1xf32>
    %20 = vector.broadcast %19 : vector<8x1xf32> to vector<8x8xf32>
    %21 = arith.mulf %16, %20 : vector<8x8xf32>
    %cst_13 = arith.constant dense<0.000000e+00> : vector<8x4xf32>
    %22 = tpu.matmul %21, %10, %cst_13 {dimension_numbers = #tpu.dot_dimension_numbers<[1], [0], [0], [1], [0, 0, 1, 1], [], []>} : vector<8x8xf32>, vector<8x4xf32>, vector<8x4xf32> -> vector<8x4xf32>
    %23 = vector.extract_strided_slice %5 {offsets = [0, 4], sizes = [8, 4], strides = [1, 1]} : vector<8x32xf32> to vector<8x4xf32>
    %24 = vector.extract_strided_slice %7 {offsets = [0, 4], sizes = [8, 4], strides = [1, 1]} : vector<8x64xf32> to vector<8x4xf32>
    %25 = vector.extract_strided_slice %7 {offsets = [0, 36], sizes = [8, 4], strides = [1, 1]} : vector<8x64xf32> to vector<8x4xf32>
    %cst_14 = arith.constant dense<0.000000e+00> : vector<8x8xf32>
    %26 = tpu.matmul %23, %24, %cst_14 {dimension_numbers = #tpu.dot_dimension_numbers<[1], [1], [0], [0], [0, 0, 1, 0], [], []>} : vector<8x4xf32>, vector<8x4xf32>, vector<8x8xf32> -> vector<8x8xf32>
    %cst_15 = arith.constant dense<0xFF800000> : vector<8xf32>
    %27 = vector.multi_reduction <maximumf>, %26, %cst_15 [1] : vector<8x8xf32> to vector<8xf32>
    %28 = vector.shape_cast %27 : vector<8xf32> to vector<8x1xf32>
    %29 = vector.broadcast %28 : vector<8x1xf32> to vector<8x8xf32>
    %30 = arith.subf %26, %29 : vector<8x8xf32>
    %31 = math.exp %30 : vector<8x8xf32>
    %cst_16 = arith.constant dense<0.000000e+00> : vector<8xf32>
    %32 = vector.multi_reduction <add>, %31, %cst_16 [1] : vector<8x8xf32> to vector<8xf32>
    %33 = vector.shape_cast %32 : vector<8xf32> to vector<8x1xf32>
    %34 = tpu.reciprocal %33 {approx = true} : vector<8x1xf32> -> vector<8x1xf32>
    %35 = vector.broadcast %34 : vector<8x1xf32> to vector<8x8xf32>
    %36 = arith.mulf %31, %35 : vector<8x8xf32>
    %cst_17 = arith.constant dense<0.000000e+00> : vector<8x4xf32>
    %37 = tpu.matmul %36, %25, %cst_17 {dimension_numbers = #tpu.dot_dimension_numbers<[1], [0], [0], [1], [0, 0, 1, 1], [], []>} : vector<8x8xf32>, vector<8x4xf32>, vector<8x4xf32> -> vector<8x4xf32>
    %38 = vector.extract_strided_slice %5 {offsets = [0, 8], sizes = [8, 4], strides = [1, 1]} : vector<8x32xf32> to vector<8x4xf32>
    %39 = vector.extract_strided_slice %7 {offsets = [0, 8], sizes = [8, 4], strides = [1, 1]} : vector<8x64xf32> to vector<8x4xf32>
    %40 = vector.extract_strided_slice %7 {offsets = [0, 40], sizes = [8, 4], strides = [1, 1]} : vector<8x64xf32> to vector<8x4xf32>
    %cst_18 = arith.constant dense<0.000000e+00> : vector<8x8xf32>
    %41 = tpu.matmul %38, %39, %cst_18 {dimension_numbers = #tpu.dot_dimension_numbers<[1], [1], [0], [0], [0, 0, 1, 0], [], []>} : vector<8x4xf32>, vector<8x4xf32>, vector<8x8xf32> -> vector<8x8xf32>
    %cst_19 = arith.constant dense<0xFF800000> : vector<8xf32>
    %42 = vector.multi_reduction <maximumf>, %41, %cst_19 [1] : vector<8x8xf32> to vector<8xf32>
    %43 = vector.shape_cast %42 : vector<8xf32> to vector<8x1xf32>
    %44 = vector.broadcast %43 : vector<8x1xf32> to vector<8x8xf32>
    %45 = arith.subf %41, %44 : vector<8x8xf32>
    %46 = math.exp %45 : vector<8x8xf32>
    %cst_20 = arith.constant dense<0.000000e+00> : vector<8xf32>
    %47 = vector.multi_reduction <add>, %46, %cst_20 [1] : vector<8x8xf32> to vector<8xf32>
    %48 = vector.shape_cast %47 : vector<8xf32> to vector<8x1xf32>
    %49 = tpu.reciprocal %48 {approx = true} : vector<8x1xf32> -> vector<8x1xf32>
    %50 = vector.broadcast %49 : vector<8x1xf32> to vector<8x8xf32>
    %51 = arith.mulf %46, %50 : vector<8x8xf32>
    %cst_21 = arith.constant dense<0.000000e+00> : vector<8x4xf32>
    %52 = tpu.matmul %51, %40, %cst_21 {dimension_numbers = #tpu.dot_dimension_numbers<[1], [0], [0], [1], [0, 0, 1, 1], [], []>} : vector<8x8xf32>, vector<8x4xf32>, vector<8x4xf32> -> vector<8x4xf32>
    %53 = vector.extract_strided_slice %5 {offsets = [0, 12], sizes = [8, 4], strides = [1, 1]} : vector<8x32xf32> to vector<8x4xf32>
    %54 = vector.extract_strided_slice %7 {offsets = [0, 12], sizes = [8, 4], strides = [1, 1]} : vector<8x64xf32> to vector<8x4xf32>
    %55 = vector.extract_strided_slice %7 {offsets = [0, 44], sizes = [8, 4], strides = [1, 1]} : vector<8x64xf32> to vector<8x4xf32>
    %cst_22 = arith.constant dense<0.000000e+00> : vector<8x8xf32>
    %56 = tpu.matmul %53, %54, %cst_22 {dimension_numbers = #tpu.dot_dimension_numbers<[1], [1], [0], [0], [0, 0, 1, 0], [], []>} : vector<8x4xf32>, vector<8x4xf32>, vector<8x8xf32> -> vector<8x8xf32>
    %cst_23 = arith.constant dense<0xFF800000> : vector<8xf32>
    %57 = vector.multi_reduction <maximumf>, %56, %cst_23 [1] : vector<8x8xf32> to vector<8xf32>
    %58 = vector.shape_cast %57 : vector<8xf32> to vector<8x1xf32>
    %59 = vector.broadcast %58 : vector<8x1xf32> to vector<8x8xf32>
    %60 = arith.subf %56, %59 : vector<8x8xf32>
    %61 = math.exp %60 : vector<8x8xf32>
    %cst_24 = arith.constant dense<0.000000e+00> : vector<8xf32>
    %62 = vector.multi_reduction <add>, %61, %cst_24 [1] : vector<8x8xf32> to vector<8xf32>
    %63 = vector.shape_cast %62 : vector<8xf32> to vector<8x1xf32>
    %64 = tpu.reciprocal %63 {approx = true} : vector<8x1xf32> -> vector<8x1xf32>
    %65 = vector.broadcast %64 : vector<8x1xf32> to vector<8x8xf32>
    %66 = arith.mulf %61, %65 : vector<8x8xf32>
    %cst_25 = arith.constant dense<0.000000e+00> : vector<8x4xf32>
    %67 = tpu.matmul %66, %55, %cst_25 {dimension_numbers = #tpu.dot_dimension_numbers<[1], [0], [0], [1], [0, 0, 1, 1], [], []>} : vector<8x8xf32>, vector<8x4xf32>, vector<8x4xf32> -> vector<8x4xf32>
    %68 = vector.extract_strided_slice %5 {offsets = [0, 16], sizes = [8, 4], strides = [1, 1]} : vector<8x32xf32> to vector<8x4xf32>
    %69 = vector.extract_strided_slice %7 {offsets = [0, 16], sizes = [8, 4], strides = [1, 1]} : vector<8x64xf32> to vector<8x4xf32>
    %70 = vector.extract_strided_slice %7 {offsets = [0, 48], sizes = [8, 4], strides = [1, 1]} : vector<8x64xf32> to vector<8x4xf32>
    %cst_26 = arith.constant dense<0.000000e+00> : vector<8x8xf32>
    %71 = tpu.matmul %68, %69, %cst_26 {dimension_numbers = #tpu.dot_dimension_numbers<[1], [1], [0], [0], [0, 0, 1, 0], [], []>} : vector<8x4xf32>, vector<8x4xf32>, vector<8x8xf32> -> vector<8x8xf32>
    %cst_27 = arith.constant dense<0xFF800000> : vector<8xf32>
    %72 = vector.multi_reduction <maximumf>, %71, %cst_27 [1] : vector<8x8xf32> to vector<8xf32>
    %73 = vector.shape_cast %72 : vector<8xf32> to vector<8x1xf32>
    %74 = vector.broadcast %73 : vector<8x1xf32> to vector<8x8xf32>
    %75 = arith.subf %71, %74 : vector<8x8xf32>
    %76 = math.exp %75 : vector<8x8xf32>
    %cst_28 = arith.constant dense<0.000000e+00> : vector<8xf32>
    %77 = vector.multi_reduction <add>, %76, %cst_28 [1] : vector<8x8xf32> to vector<8xf32>
    %78 = vector.shape_cast %77 : vector<8xf32> to vector<8x1xf32>
    %79 = tpu.reciprocal %78 {approx = true} : vector<8x1xf32> -> vector<8x1xf32>
    %80 = vector.broadcast %79 : vector<8x1xf32> to vector<8x8xf32>
    %81 = arith.mulf %76, %80 : vector<8x8xf32>
    %cst_29 = arith.constant dense<0.000000e+00> : vector<8x4xf32>
    %82 = tpu.matmul %81, %70, %cst_29 {dimension_numbers = #tpu.dot_dimension_numbers<[1], [0], [0], [1], [0, 0, 1, 1], [], []>} : vector<8x8xf32>, vector<8x4xf32>, vector<8x4xf32> -> vector<8x4xf32>
    %83 = vector.extract_strided_slice %5 {offsets = [0, 20], sizes = [8, 4], strides = [1, 1]} : vector<8x32xf32> to vector<8x4xf32>
    %84 = vector.extract_strided_slice %7 {offsets = [0, 20], sizes = [8, 4], strides = [1, 1]} : vector<8x64xf32> to vector<8x4xf32>
    %85 = vector.extract_strided_slice %7 {offsets = [0, 52], sizes = [8, 4], strides = [1, 1]} : vector<8x64xf32> to vector<8x4xf32>
    %cst_30 = arith.constant dense<0.000000e+00> : vector<8x8xf32>
    %86 = tpu.matmul %83, %84, %cst_30 {dimension_numbers = #tpu.dot_dimension_numbers<[1], [1], [0], [0], [0, 0, 1, 0], [], []>} : vector<8x4xf32>, vector<8x4xf32>, vector<8x8xf32> -> vector<8x8xf32>
    %cst_31 = arith.constant dense<0xFF800000> : vector<8xf32>
    %87 = vector.multi_reduction <maximumf>, %86, %cst_31 [1] : vector<8x8xf32> to vector<8xf32>
    %88 = vector.shape_cast %87 : vector<8xf32> to vector<8x1xf32>
    %89 = vector.broadcast %88 : vector<8x1xf32> to vector<8x8xf32>
    %90 = arith.subf %86, %89 : vector<8x8xf32>
    %91 = math.exp %90 : vector<8x8xf32>
    %cst_32 = arith.constant dense<0.000000e+00> : vector<8xf32>
    %92 = vector.multi_reduction <add>, %91, %cst_32 [1] : vector<8x8xf32> to vector<8xf32>
    %93 = vector.shape_cast %92 : vector<8xf32> to vector<8x1xf32>
    %94 = tpu.reciprocal %93 {approx = true} : vector<8x1xf32> -> vector<8x1xf32>
    %95 = vector.broadcast %94 : vector<8x1xf32> to vector<8x8xf32>
    %96 = arith.mulf %91, %95 : vector<8x8xf32>
    %cst_33 = arith.constant dense<0.000000e+00> : vector<8x4xf32>
    %97 = tpu.matmul %96, %85, %cst_33 {dimension_numbers = #tpu.dot_dimension_numbers<[1], [0], [0], [1], [0, 0, 1, 1], [], []>} : vector<8x8xf32>, vector<8x4xf32>, vector<8x4xf32> -> vector<8x4xf32>
    %98 = vector.extract_strided_slice %5 {offsets = [0, 24], sizes = [8, 4], strides = [1, 1]} : vector<8x32xf32> to vector<8x4xf32>
    %99 = vector.extract_strided_slice %7 {offsets = [0, 24], sizes = [8, 4], strides = [1, 1]} : vector<8x64xf32> to vector<8x4xf32>
    %100 = vector.extract_strided_slice %7 {offsets = [0, 56], sizes = [8, 4], strides = [1, 1]} : vector<8x64xf32> to vector<8x4xf32>
    %cst_34 = arith.constant dense<0.000000e+00> : vector<8x8xf32>
    %101 = tpu.matmul %98, %99, %cst_34 {dimension_numbers = #tpu.dot_dimension_numbers<[1], [1], [0], [0], [0, 0, 1, 0], [], []>} : vector<8x4xf32>, vector<8x4xf32>, vector<8x8xf32> -> vector<8x8xf32>
    %cst_35 = arith.constant dense<0xFF800000> : vector<8xf32>
    %102 = vector.multi_reduction <maximumf>, %101, %cst_35 [1] : vector<8x8xf32> to vector<8xf32>
    %103 = vector.shape_cast %102 : vector<8xf32> to vector<8x1xf32>
    %104 = vector.broadcast %103 : vector<8x1xf32> to vector<8x8xf32>
    %105 = arith.subf %101, %104 : vector<8x8xf32>
    %106 = math.exp %105 : vector<8x8xf32>
    %cst_36 = arith.constant dense<0.000000e+00> : vector<8xf32>
    %107 = vector.multi_reduction <add>, %106, %cst_36 [1] : vector<8x8xf32> to vector<8xf32>
    %108 = vector.shape_cast %107 : vector<8xf32> to vector<8x1xf32>
    %109 = tpu.reciprocal %108 {approx = true} : vector<8x1xf32> -> vector<8x1xf32>
    %110 = vector.broadcast %109 : vector<8x1xf32> to vector<8x8xf32>
    %111 = arith.mulf %106, %110 : vector<8x8xf32>
    %cst_37 = arith.constant dense<0.000000e+00> : vector<8x4xf32>
    %112 = tpu.matmul %111, %100, %cst_37 {dimension_numbers = #tpu.dot_dimension_numbers<[1], [0], [0], [1], [0, 0, 1, 1], [], []>} : vector<8x8xf32>, vector<8x4xf32>, vector<8x4xf32> -> vector<8x4xf32>
    %113 = vector.extract_strided_slice %5 {offsets = [0, 28], sizes = [8, 4], strides = [1, 1]} : vector<8x32xf32> to vector<8x4xf32>
    %114 = vector.extract_strided_slice %7 {offsets = [0, 28], sizes = [8, 4], strides = [1, 1]} : vector<8x64xf32> to vector<8x4xf32>
    %115 = vector.extract_strided_slice %7 {offsets = [0, 60], sizes = [8, 4], strides = [1, 1]} : vector<8x64xf32> to vector<8x4xf32>
    %cst_38 = arith.constant dense<0.000000e+00> : vector<8x8xf32>
    %116 = tpu.matmul %113, %114, %cst_38 {dimension_numbers = #tpu.dot_dimension_numbers<[1], [1], [0], [0], [0, 0, 1, 0], [], []>} : vector<8x4xf32>, vector<8x4xf32>, vector<8x8xf32> -> vector<8x8xf32>
    %cst_39 = arith.constant dense<0xFF800000> : vector<8xf32>
    %117 = vector.multi_reduction <maximumf>, %116, %cst_39 [1] : vector<8x8xf32> to vector<8xf32>
    %118 = vector.shape_cast %117 : vector<8xf32> to vector<8x1xf32>
    %119 = vector.broadcast %118 : vector<8x1xf32> to vector<8x8xf32>
    %120 = arith.subf %116, %119 : vector<8x8xf32>
    %121 = math.exp %120 : vector<8x8xf32>
    %cst_40 = arith.constant dense<0.000000e+00> : vector<8xf32>
    %122 = vector.multi_reduction <add>, %121, %cst_40 [1] : vector<8x8xf32> to vector<8xf32>
    %123 = vector.shape_cast %122 : vector<8xf32> to vector<8x1xf32>
    %124 = tpu.reciprocal %123 {approx = true} : vector<8x1xf32> -> vector<8x1xf32>
    %125 = vector.broadcast %124 : vector<8x1xf32> to vector<8x8xf32>
    %126 = arith.mulf %121, %125 : vector<8x8xf32>
    %cst_41 = arith.constant dense<0.000000e+00> : vector<8x4xf32>
    %127 = tpu.matmul %126, %115, %cst_41 {dimension_numbers = #tpu.dot_dimension_numbers<[1], [0], [0], [1], [0, 0, 1, 1], [], []>} : vector<8x8xf32>, vector<8x4xf32>, vector<8x4xf32> -> vector<8x4xf32>
    %128 = tpu.concatenate %22, %37, %52, %67, %82, %97, %112, %127 in 1 : vector<8x4xf32>, vector<8x4xf32>, vector<8x4xf32>, vector<8x4xf32>, vector<8x4xf32>, vector<8x4xf32>, vector<8x4xf32>, vector<8x4xf32> -> vector<8x32xf32>
    %c0_42 = arith.constant 0 : index
    %c0_43 = arith.constant 0 : index
    %129 = vector.load %arg6[%c0_42, %c0_43] : memref<32x32xf32, #tpu.memory_space<vmem>>, vector<32x32xf32>
    %cst_44 = arith.constant dense<0.000000e+00> : vector<8x32xf32>
    %130 = tpu.matmul %128, %129, %cst_44 {dimension_numbers = #tpu.dot_dimension_numbers<[1], [0], [0], [1], [0, 0, 1, 1], [], []>} : vector<8x32xf32>, vector<32x32xf32>, vector<8x32xf32> -> vector<8x32xf32>
    %c0_45 = arith.constant 0 : index
    %c0_46 = arith.constant 0 : index
    %131 = vector.load %arg7[%c0_45, %c0_46] : memref<1x32xf32, #tpu.memory_space<vmem>>, vector<1x32xf32>
    %132 = vector.broadcast %131 : vector<1x32xf32> to vector<8x32xf32>
    %133 = arith.addf %130, %132 : vector<8x32xf32>
    %c0_47 = arith.constant 0 : index
    %c0_48 = arith.constant 0 : index
    %c0_49 = arith.constant 0 : index
    %134 = vector.load %arg8[%c0_47, %c0_48, %c0_49] : memref<1x8x32xf32, #tpu.memory_space<vmem>>, vector<1x8x32xf32>
    %135 = vector.shape_cast %134 : vector<1x8x32xf32> to vector<8x32xf32>
    %136 = vector.shape_cast %133 : vector<8x32xf32> to vector<1x8x32xf32>
    tpu.vector_store %arg8[%c0_47, %c0_48, %c0_49], %136 {strides = array<i32>} : memref<1x8x32xf32, #tpu.memory_space<vmem>>, vector<1x8x32xf32>,
    return
  }
  func.func @transform_0(%arg0: i32, %arg1: i32) -> (i32, i32, i32) {
    %c0_i32 = arith.constant 0 : i32
    %c0_i32_0 = arith.constant 0 : i32
    return %arg0, %arg1, %c0_i32 : i32, i32, i32
  }
  func.func @transform_1(%arg0: i32, %arg1: i32) -> (i32, i32, i32) {
    %c0_i32 = arith.constant 0 : i32
    %c0_i32_0 = arith.constant 0 : i32
    %c0_i32_1 = arith.constant 0 : i32
    return %arg0, %c0_i32, %c0_i32_0 : i32, i32, i32
  }
  func.func @transform_2(%arg0: i32, %arg1: i32) -> (i32, i32) {
    %c0_i32 = arith.constant 0 : i32
    %c0_i32_0 = arith.constant 0 : i32
    %c0_i32_1 = arith.constant 0 : i32
    return %c0_i32, %c0_i32_0 : i32, i32
  }
  func.func @transform_3(%arg0: i32, %arg1: i32) -> (i32, i32) {
    %c0_i32 = arith.constant 0 : i32
    %c0_i32_0 = arith.constant 0 : i32
    %c0_i32_1 = arith.constant 0 : i32
    return %c0_i32, %c0_i32_0 : i32, i32
  }
  func.func @transform_4(%arg0: i32, %arg1: i32) -> (i32, i32) {
    %c0_i32 = arith.constant 0 : i32
    %c0_i32_0 = arith.constant 0 : i32
    %c0_i32_1 = arith.constant 0 : i32
    return %c0_i32, %c0_i32_0 : i32, i32
  }
  func.func @transform_5(%arg0: i32, %arg1: i32) -> (i32, i32) {
    %c0_i32 = arith.constant 0 : i32
    %c0_i32_0 = arith.constant 0 : i32
    %c0_i32_1 = arith.constant 0 : i32
    return %c0_i32, %c0_i32_0 : i32, i32
  }
  func.func @transform_6(%arg0: i32, %arg1: i32) -> (i32, i32, i32) {
    %c0_i32 = arith.constant 0 : i32
    %c0_i32_0 = arith.constant 0 : i32
    return %arg0, %arg1, %c0_i32 : i32, i32, i32
  }
}

</mosaic_0001>

<bundles_post_ra>
// kernel: tpu_custom_call.1
= control target key start
LH: loop header
LB: loop body
LE: loop exit
PB: predicated region body
PF: predicated region fallthrough
CT: control target
= control target key end

     0   :  { %s3143_s0 = inlined_call_operand.hbm [shape: f32[2,8,32], index: 0, kind: input, shape index: {}]   ;;  %s3144_s1 = inlined_call_operand.hbm [shape: f32[2,8,32], index: 1, kind: input, shape index: {}]   ;;  %s3145_s2 = inlined_call_operand.hbm [shape: f32[32,32], index: 2, kind: input, shape index: {}]   ;;  %s3146_s3 = inlined_call_operand.hbm [shape: f32[32,64], index: 3, kind: input, shape index: {}]   ;;  %s3147_s4 = inlined_call_operand.hbm [shape: f32[32,32], index: 4, kind: input, shape index: {}]   ;;  %s3148_s5 = inlined_call_operand.vmem [shape: f32[1,32], index: 5, kind: input, shape index: {}]   ;;  %s3149_s6 = inlined_call_operand.hbm [shape: f32[2,8,32], index: 6, kind: output, shape index: {}]  }
   0x1   :  { %3152 = sst [smem:[#allocation17_spill]] %s3143_s0 }
   0x2   :  { %3153 = sst [smem:[#allocation18_spill]] %s3145_s2 }
   0x3   :  { %3154 = sst [smem:[#allocation19_spill]] %s3146_s3 }
   0x4   :  { %3155 = sst [smem:[#allocation20_spill]] %s3147_s4 }
   0x5   :  { %11 = vsyncpa [#allocation3], 0 }
   0x6   :  { %13 = vsyncpa [#allocation3 + $0x1], 0 }
   0x7   :  { %14 = vsyncpa [#allocation6], 0 }
   0x8   :  { %16 = vsyncpa [#allocation6 + $0x1], 0 }
   0x9   :  { %17 = vsyncpa [#allocation9], 0 }
   0xa   :  { %18 = vsyncpa [#allocation4], 0 }
   0xb   :  { %20 = vsyncpa [#allocation4 + $0x1], 0  ;;  %s2773_s21 = smov 0   ;;  %s2775_s22 = smov 0  }
   0xc   :  { %s2777_s23 = smov 0   ;;  %s2779_s24 = smov 0  }
   0xd   :  { %s2781_s25 = smov 0   ;;  %s2783_s26 = smov 0  }
   0xe LB: > { %s2804_s27 = sadd.s32 4294967295, %s2704_s26   ;;  %s2113_s28 = sadd.s32 4294967294, %s2704_s26   ;;  %s2704_s26 = sphi %s2783_s26, %s26_s26   ;;  %s2700_s25 = sphi %s2781_s25, %s3178_s25   ;;  %s2696_s24 = sphi %s2779_s24, %s3177_s24   ;;  %s2692_s23 = sphi %s2777_s23, %s3176_s23   ;;  %s2688_s22 = sphi %s2775_s22, %s3175_s22   ;;  %s2684_s21 = sphi %s2773_s21, %s3174_s21  }
   0xf   : > { %p60_p0 = scmp.ne.s32.totalorder %s2688_s22, %s2684_s21  ;;  %p3150_p1 = scmp.eq.s32.totalorder %s2804_s27, 0 }
  0x10   : > { %p202_p3 = scmp.eq.s32.totalorder %s2113_s28, 1  ;;  %p2114_p5 = scmp.ge.s32.totalorder %s2704_s26, 1 }
  0x11   : > { %p2813_p4 = por %p3150_p1, %p60_p0  ;;  %p209_p7 = scmp.lt.s32.totalorder %s2704_s26, 3 }
  0x12   : > { %p2818_p6 = por %p202_p3, %p60_p0  ;;  %s2706_s8 = smov [#allocation7]  }
  0x13   : > { %s3156_s29 = scalar_select %p2813_p4, 1, 0 }
  0x14   : > { %s3157_s30 = scalar_select %p2818_p6, 1, 0 }
  0x15   : > { %p2823_p8 = pnand %p2114_p5, %p209_p7  ;;  %s221_s9 = sshll.u32 %s2706_s8, 4  ;;  %s222_s9 = int_to_ptr.vmem [resolvable:$true] %s221_s9 }
  0x16   : > { %s2707_s11 = smov [#allocation8]   ;;  %s2708_s13 = smov [#allocation10]  }
  0x17   : > { %p2340_p9 = pneg %p2823_p8  ;;  %s234_s12 = sshll.u32 %s2707_s11, 4  ;;  %s235_s12 = int_to_ptr.vmem [resolvable:$true] %s234_s12 }
  0x18   : > { %s247_s14 = sshll.u32 %s2708_s13, 4  ;;  %s2489_s15 = scalar_lea.vmem %s222_s9, 512  ;;  %s248_s14 = int_to_ptr.vmem [resolvable:$true] %s247_s14 }
  0x19   : > { %p2832_p11 = pnand %p2340_p9, %p3150_p1  ;;  %p2490_p13 = scmp.ne.s32.totalorder %s222_s9, %s2489_s15 }
  0x1a   : > { %p2497_p5 = scmp.lt.s32.totalorder %s222_s9, %s222_s9  ;;  %p2498_p7 = scmp.lt.s32.totalorder %s2489_s15, %s2489_s15 }
  0x1b   : > { %p2480_p12 = pneg %p2832_p11 }
  0x1c   : > { %p2499_p9 = por %p2498_p7, %p2497_p5 }
  0x1d   : > { %p2492_p0 = pnand %p2490_p13, %p2480_p12 }
  0x1f   : > { %p2493_p3 = pneg %p2492_p0 }
  0x21   : > { %p2500_p10 = pnand %p2499_p9, %p2493_p3 }
  0x23   : > { %2503 = shalt.err (!%p2500_p10)
}
  0x24   : > { %s2709_s16 = smov 128   ;;  %s2710_s17 = smov 8  }
  0x25   : > { %s3160_s2 = sld [smem:[#allocation18_spill]]  ;;  %s2515_s20 = scalar_lea.vmem %s235_s12, 512 }
  0x26   : > { %p2516_p1 = scmp.ne.s32.totalorder %s235_s12, %s2515_s20  ;;  %p2523_p2 = scmp.lt.s32.totalorder %s235_s12, %s235_s12 }
  0x27   : > { %p2524_p6 = scmp.lt.s32.totalorder %s2515_s20, %s2515_s20 }
  0x28   : > { %p2518_p13 = pnand %p2516_p1, %p2480_p12 }
  0x29   : > { %p2525_p5 = por %p2524_p6, %p2523_p2 }
  0x2a   : > { %p2519_p0 = pneg %p2518_p13 }
  0x2b   : > { %2343 = dma.hbm_to_vmem [thread:$0]  (!%p2832_p11), %s3160_s2, 512, %s222_s9, [#allocation6], %s2709_s16, %s2709_s16, %s2710_s17  }
  0x2c   : > { %p2526_p3 = pnand %p2525_p5, %p2519_p0 }
  0x2e   : > { %2529 = shalt.err (!%p2526_p3)
}
  0x2f   : > { %s3161_s3 = sld [smem:[#allocation19_spill]]  ;;  %s2541_s9 = scalar_lea.vmem %s248_s14, 512 }
  0x30   : > { %p2542_p10 = scmp.ne.s32.totalorder %s248_s14, %s2541_s9  ;;  %p2549_p9 = scmp.lt.s32.totalorder %s248_s14, %s248_s14 }
  0x31   : > { %p2550_p13 = scmp.lt.s32.totalorder %s2541_s9, %s2541_s9 }
  0x32   : > { %p2544_p7 = pnand %p2542_p10, %p2480_p12 }
  0x33   : > { %p2551_p4 = por %p2550_p13, %p2549_p9 }
  0x34   : > { %p2545_p1 = pneg %p2544_p7 }
  0x35   : > { %2346 = dma.hbm_to_vmem [thread:$0]  (!%p2832_p11), %s3161_s3, 512, %s235_s12, [#allocation9], %s2709_s16, %s2709_s16, %s2710_s17  }
  0x36   : > { %p2552_p2 = pnand %p2551_p4, %p2545_p1 }
  0x38   : > { %2555 = shalt.err (!%p2552_p2)
}
  0x39   : > { %s3162_s4 = sld [smem:[#allocation20_spill]]  ;;  %s47_s12 = sadd.s32 1, %s2692_s23 }
  0x3a   : > { %s38_s15 = sadd.s32 1, %s2700_s25  ;;  %p54_p4 = scmp.ne.s32.totalorder %s2692_s23, %s2688_s22 }
  0x3b   : > { %p40_p6 = scmp.ge.s32.totalorder %s38_s15, 2  ;;  %p55_p12 = scmp.eq.s32.totalorder %s2704_s26, 0 }
  0x3c   : > { %p3163_p0 = scmp.eq.s32.totalorder %s2804_s27, 1  ;;  %p2364_p3 = scmp.lt.s32.totalorder %s2704_s26, 2 }
  0x3d   : > { %s3180_s15 = smov (%p40_p6, %s38_s15), 0  ;;  %p56_p10 = por %p55_p12, %p54_p4 }
  0x3e   : > { %p2869_p5 = por %p3163_p0, %p54_p4  ;;  %s264_s18 = sand.u32 1, %s2692_s23  }
  0x3f   : > { %2349 = dma.hbm_to_vmem [thread:$0]  (!%p2832_p11), %s3162_s4, 512, %s248_s14, [#allocation9], %s2709_s16, %s2709_s16, %s2710_s17  }
  0x40   : > { %s42_s19 = ssub.s32 %s2700_s25, %s3180_s15  ;;  %s2119_s14 = sshll.u32 %s264_s18, 3 }
  0x41   : > { %p45_p11 = scmp.eq.s32.totalorder %s42_s19, 0  ;;  %s2120_s16 = sshll.u32 %s2700_s25, 7 }
  0x42   : > { %s3165_s0 = sld [smem:[#allocation17_spill]]  ;;  %s268_s9 = scalar_lea.vmem [#allocation2], %s2119_s14 }
  0x43   : > { %s2881_s17 = scalar_select %p45_p11, %s2692_s23, %s47_s12  }
  0x44   : > { %s276_s11 = sshll.u32 %s268_s9, 4  ;;  %p2888_p7 = pnand %p2364_p3, %p56_p10  ;;  %s277_s11 = int_to_ptr.vmem [resolvable:$true] %s276_s11 }
  0x45   : > { %s2895_s19 = scalar_lea.hbm %s3144_s1, %s2120_s16  ;;  %s283_s12 = sand.u32 1, %s2704_s26  }
  0x46   : > { %s265_s4 = scalar_lea.sflag [#allocation3], %s264_s18  ;;  %p2558_p1 = pneg %p2888_p7 }
  0x47   : > { %s2569_s20 = scalar_lea.vmem %s277_s11, 128  ;;  %s2711_s28 = smov [#allocation2]  }
  0x48   : > { %s274_s8 = scalar_lea.hbm %s3165_s0, %s2120_s16  ;;  %p2570_p9 = scmp.ne.s32.totalorder %s277_s11, %s2569_s20 }
  0x49   : > { %s2574_s9 = sshll.u32 %s2711_s28, 4  ;;  %s2575_s9 = int_to_ptr.vmem [resolvable:$false] %s2574_s9 }
  0x4a   : > { %p2572_p13 = pnand %p2570_p9, %p2558_p1  ;;  %s2576_s0 = scalar_lea.vmem %s2575_s9, 256 }
  0x4b   : > { %p2577_p4 = scmp.lt.s32.totalorder %s277_s11, %s2575_s9  ;;  %p2578_p6 = scmp.lt.s32.totalorder %s2576_s0, %s2569_s20 }
  0x4c   : > { %p2573_p2 = pneg %p2572_p13 }
  0x4d   : > { %p2579_p12 = por %p2578_p6, %p2577_p4 }
  0x4f   : > { %p2580_p0 = pnand %p2579_p12, %p2573_p2 }
  0x51   : > { %2583 = shalt.err (!%p2580_p0)
}
  0x52   : > { %2353 = dma.hbm_to_vmem [thread:$0]  (!%p2888_p7), %s274_s8, 128, %s277_s11, %s265_s4  }
  0x53   : > { %s287_s2 = scalar_lea.vmem [#allocation5], %s2119_s14  ;;  %s284_s18 = scalar_lea.sflag [#allocation6], %s283_s12 }
  0x54   : > { %s294_s3 = sshll.u32 %s287_s2, 4  ;;  %s2712_s28 = smov [#allocation5]   ;;  %s295_s3 = int_to_ptr.vmem [resolvable:$true] %s294_s3 }
  0x55   : > { %s2597_s16 = scalar_lea.vmem %s295_s3, 128  ;;  %s2602_s9 = sshll.u32 %s2712_s28, 4  ;;  %s2603_s9 = int_to_ptr.vmem [resolvable:$false] %s2602_s9 }
  0x56   : > { %p2598_p3 = scmp.ne.s32.totalorder %s295_s3, %s2597_s16  ;;  %s2604_s0 = scalar_lea.vmem %s2603_s9, 256 }
  0x57   : > { %p2605_p9 = scmp.lt.s32.totalorder %s295_s3, %s2603_s9  ;;  %p2606_p13 = scmp.lt.s32.totalorder %s2604_s0, %s2597_s16 }
  0x58   : > { %p2600_p10 = pnand %p2598_p3, %p2558_p1 }
  0x59   : > { %p2607_p2 = por %p2606_p13, %p2605_p9 }
  0x5a   : > { %p2601_p11 = pneg %p2600_p10 }
  0x5c   : > { %p2608_p4 = pnand %p2607_p2, %p2601_p11 }
  0x5e   : > { %2611 = shalt.err (!%p2608_p4)
}
  0x5f   : > { %2356 = dma.hbm_to_vmem [thread:$0]  (!%p2888_p7), %s2895_s19, 128, %s295_s3, %s284_s18  }
  0x60   : > { %303 = sbr.rel (%p2823_p8) target bundleno = 1526 (0x5f6), region = 44  ;;  %s2914_s4 = sand.u32 (!%p2823_p8), 1, %s2688_s22  }
  0x61   : > { %s2917_s14 = sshll.u32 (!%p2823_p8), %s2914_s4, 3  ;;  %s306_s8 = scalar_lea.sflag (!%p2823_p8), [#allocation3], %s2914_s4 }
  0x62   : > { %s309_s11 = scalar_lea.vmem (!%p2823_p8), [#allocation2], %s2917_s14  ;;  %p3167_p1 = scmp.ne.s32.totalorder (!%p2823_p8), %s3156_s29, 0 }
  0x65   : > { %2663 = dma.done.wait (%p3167_p1), %s306_s8, 128  }
  0x66   : > { %2665 = vsyncadd (%p3167_p1), %s306_s8, 4294967168  ;;  %s314_s7 = sand.u32 1, %s2804_s27   ;;  %s318_s19 = scalar_lea.vmem [#allocation5], %s2917_s14 }
  0x67   : > { %s315_s13 = scalar_lea.sflag [#allocation6], %s314_s7 }
  0x68   : > { %2667 = dma.done.wait (%p3167_p1), %s315_s13, 128  }
  0x69   : > { %2669 = vsyncadd (%p3167_p1), %s315_s13, 4294967168  ;;  %p3168_p8 = scmp.eq.s32.totalorder %s2804_s27, 0 }
  0x6b   : > { %2671 = dma.done.wait (%p3168_p8), [#allocation6], 512   ;;  %p3169_p7 = pmov %p3168_p8 }
  0x6d   : > { %2673 = vsyncadd (%p3169_p7), [#allocation6], 4294966784  ;;  %p3170_p6 = pmov %p3169_p7 }
  0x6f   : > { %2675 = dma.done.wait (%p3170_p6), [#allocation9], 1024   ;;  %p3171_p12 = pmov %p3170_p6 }
  0x70   : > { %v2713_v0 = vmov 0.0   ;;  %vm2714_vm0 = vmmov 0   ;;  %v447_v1 = vld [vmem:[#allocation8 + $0x18] sm:$0xff]  ;;  %v446_v3 = vld [vmem:[#allocation8 + $0x10] sm:$0xff]  ;;  %v445_v5 = vld [vmem:[#allocation8 + $0x8] sm:$0xff]  ;;  %vm370_vm1 = vcmask 261120  }
  0x71   : > { %2677 = vsyncadd (%p3171_p12), [#allocation9], 4294966272  ;;  %2220 = vmatprep.subr.mxu1 %v2713_v0  ;;  %2209 = vmatprep.subr.mxu0 %v2713_v0  ;;  %v369_v2 = vld [vmem:[#allocation7 + $0x18] sm:$0xff]  ;;  %v368_v4 = vld [vmem:[#allocation7 + $0x10] sm:$0xff]  ;;  %vm521_vm2 = vcmask 31744   ;;  %s2715_s27 = smov 120  }
  0x72   : > { %2228 = vmatprep.mubr.msk.f32.mxu1 %vm2714_vm0, %v2713_v0  ;;  %2217 = vmatprep.mubr.msk.f32.mxu0 %vm2714_vm0, %v2713_v0  ;;  %v367_v6 = vld [vmem:[#allocation7 + $0x8] sm:$0xff]  ;;  %v444_v7 = vld [vmem:[#allocation8] sm:$0xff]  ;;  %v365_v9 = vld [vmem:[%s318_s19] sm:$0xff]  ;;  %s2716_s29 = smov 124   ;;  %s2717_s12 = smov 116   ;;  %vm598_vm3 = vcmask 64512  }
  0x73   : > { %2221 = vmatpush3.msra.mxu1 %v447_v1  ;;  %2210 = vmatpush3.msra.mxu0 %v369_v2  ;;  %v366_v8 = vld [vmem:[#allocation7] sm:$0xff]  ;;  %s2718_s20 = smov 112   ;;  %s2719_s2 = smov 108   ;;  %vm1871_vm4 = vcmask 97280   ;;  %vm1873_vm5 = vcmask 130048   ;;  %vm1875_vm6 = vcmask 162816  }
  0x74   : > { %2222 = vmatprep.subr.mxu1 %v2713_v0  ;;  %2211 = vmatprep.subr.mxu0 %v2713_v0  ;;  %v364_v10 = vld [vmem:[%s309_s11] sm:$0xff]  ;;  %s2720_s3 = smov 104   ;;  %s2721_s18 = smov 100   ;;  %vm1877_vm7 = vcmask 195584   ;;  %vm1879_vm8 = vcmask 228352  }
  0x75   : > { %2223 = vmatpush3.msra.mxu1 %v446_v3  ;;  %2212 = vmatpush3.msra.mxu0 %v368_v4  ;;  %s2722_s16 = smov 92   ;;  %s2723_s28 = smov 96  }
  0x76   : > { %2224 = vmatprep.subr.mxu1 %v2713_v0  ;;  %2213 = vmatprep.subr.mxu0 %v2713_v0  ;;  %s2724_s9 = smov 84   ;;  %s2725_s0 = smov 88  }
  0x77   : > { %2225 = vmatpush3.msra.mxu1 %v445_v5  ;;  %2214 = vmatpush3.msra.mxu0 %v367_v6  ;;  %s2726_s8 = smov 76   ;;  %s2727_s11 = smov 80  }
  0x78   : > { %2226 = vmatprep.subr.mxu1 %v2713_v0  ;;  %2215 = vmatprep.subr.mxu0 %v2713_v0  ;;  %s2728_s7 = smov 68   ;;  %s2729_s13 = smov 72  }
  0x79   : > { %2227 = vmatpush3.msra.mxu1 %v444_v7  ;;  %2216 = vmatpush3.msra.mxu0 %v366_v8  ;;  %s2730_s19 = smov 4  }
  0x7a   : > { %2229 = vmatmul.mubr.msk.f32.vlgmr.msra.gmra.mxu1 %vm370_vm1, %v365_v9  ;;  %2218 = vmatmul.mubr.msk.f32.vlgmr.msra.gmra.mxu0 %vm370_vm1, %v364_v10 }
  0x7b   : > { %2231 = vmatprep.subr.mxu1 %v2713_v0  ;;  %2233 = vmatprep.mubr.msk.f32.mxu1 %vm2714_vm0, %v2713_v0 }
  0x7c   : > { %2241 = vmatprep.subr.mxu0 %v2713_v0  ;;  %2243 = vmatprep.mubr.msk.f32.mxu0 %vm2714_vm0, %v2713_v0 }
 0x13a   : > { %v2963_v11 = vpop.f32.mrf.mxu1  ;;  %v440_v12 = vpop.f32.mrf.mxu0 }
 0x13b   : > { %853 = vrot.lane.b32.xlu1 %v2963_v11, %s2715_s27  ;;  %688 = vrot.lane.b32.xlu0 %v2963_v11, %s2716_s29 }
 0x13c   : > { %2232 = vmatpush3.xpose.msk.msra.mxu1 %vm521_vm2, %v2963_v11  ;;  %v2230_v13 = vpop.f32.mrf.mxu1  ;;  %v2219_v14 = vpop.f32.mrf.mxu0 }
 0x13d   : > { %2236 = vmatprep.subr.mxu1 %v2713_v0 }
 0x13f   : > { %2234 = vmatmul.mubr.msk.f32.vlgmr.msra.gmra.mxu1 %vm521_vm2, %v440_v12  ;;  %851 = vrot.lane.b32.xlu1 %v440_v12, %s2715_s27  ;;  %s2731_s27 = smov 8  }
 0x140   : > { %686 = vrot.lane.b32.xlu0 %v440_v12, %s2716_s29  ;;  %2238 = vmatprep.mubr.msk.f32.mxu1 %vm2714_vm0, %v2713_v0  ;;  %s2732_s29 = smov 12  }
 0x143   : > { %1016 = vrot.lane.b32.xlu1 %v440_v12, %s2717_s12 }
 0x144   : > { %1018 = vrot.lane.b32.xlu0 %v2963_v11, %s2717_s12  ;;  %s2733_s12 = smov 16  }
 0x147   : > { %1181 = vrot.lane.b32.xlu1 %v440_v12, %s2718_s20 }
 0x148   : > { %1183 = vrot.lane.b32.xlu0 %v2963_v11, %s2718_s20  ;;  %s2734_s20 = smov 20  }
 0x14b   : > { %1346 = vrot.lane.b32.xlu1 %v440_v12, %s2719_s2 }
 0x14c   : > { %1348 = vrot.lane.b32.xlu0 %v2963_v11, %s2719_s2  ;;  %s2735_s2 = smov 24  }
 0x14f   : > { %1511 = vrot.lane.b32.xlu1 %v440_v12, %s2720_s3 }
 0x150   : > { %1513 = vrot.lane.b32.xlu0 %v2963_v11, %s2720_s3  ;;  %s2736_s3 = smov 28  }
 0x153   : > { %1676 = vrot.lane.b32.xlu1 %v440_v12, %s2721_s18 }
 0x154   : > { %1678 = vrot.lane.b32.xlu0 %v2963_v11, %s2721_s18 }
 0x157   : > { %775 = vrot.lane.b32.xlu1 %v2963_v11, %s2722_s16 }
 0x158   : > { %610 = vrot.lane.b32.xlu0 %v2963_v11, %s2723_s28  ;;  %s2159_s28 = sshll.u32 %s2696_s24, 7  ;;  %s2737_s24 = smov [#allocation11]  }
 0x1ad   : > { %v854_v15 = vpop.permute.xlu1 %853  ;;  %v689_v16 = vpop.permute.xlu0 %688 }
 0x1ae   : > { %2242 = vmatpush3.xpose.msk.msra.mxu0 %vm521_vm2, %v689_v16 }
 0x1af   : > { %2251 = vmatprep.subr.mxu0 %v2713_v0 }
 0x1b1   : > { %v852_v17 = vpop.permute.xlu1 %851 }
 0x1b2   : > { %v687_v18 = vpop.permute.xlu0 %686 }
 0x1b3   : > { %2244 = vmatmul.mubr.msk.f32.vlgmr.msra.gmra.mxu0 %vm521_vm2, %v687_v18 }
 0x1b4   : > { %2252 = vmatpush3.xpose.msk.msra.mxu0 %vm521_vm2, %v854_v15  ;;  %2253 = vmatprep.mubr.msk.f32.mxu0 %vm2714_vm0, %v2713_v0 }
 0x1b5   : > { %v1017_v19 = vpop.permute.xlu1 %1016  ;;  %2261 = vmatprep.subr.mxu0 %v2713_v0 }
 0x1b6   : > { %v1019_v20 = vpop.permute.xlu0 %1018 }
 0x1b7   : > { %2254 = vmatmul.mubr.msk.f32.vlgmr.msra.gmra.mxu0 %vm521_vm2, %v852_v17 }
 0x1b8   : > { %2262 = vmatpush3.xpose.msk.msra.mxu0 %vm521_vm2, %v1019_v20  ;;  %2263 = vmatprep.mubr.msk.f32.mxu0 %vm2714_vm0, %v2713_v0 }
 0x1b9   : > { %v1182_v21 = vpop.permute.xlu1 %1181  ;;  %2271 = vmatprep.subr.mxu0 %v2713_v0 }
 0x1ba   : > { %v1184_v22 = vpop.permute.xlu0 %1183 }
 0x1bb   : > { %2264 = vmatmul.mubr.msk.f32.vlgmr.msra.gmra.mxu0 %vm521_vm2, %v1017_v19 }
 0x1bc   : > { %2272 = vmatpush3.xpose.msk.msra.mxu0 %vm521_vm2, %v1184_v22  ;;  %2273 = vmatprep.mubr.msk.f32.mxu0 %vm2714_vm0, %v2713_v0 }
 0x1bd   : > { %2281 = vmatprep.subr.mxu0 %v2713_v0  ;;  %v1347_v23 = vpop.permute.xlu1 %1346 }
 0x1be   : > { %v1349_v24 = vpop.permute.xlu0 %1348 }
 0x1bf   : > { %2274 = vmatmul.mubr.msk.f32.vlgmr.msra.gmra.mxu0 %vm521_vm2, %v1182_v21 }
 0x1c0   : > { %2282 = vmatpush3.xpose.msk.msra.mxu0 %vm521_vm2, %v1349_v24  ;;  %2283 = vmatprep.mubr.msk.f32.mxu0 %vm2714_vm0, %v2713_v0 }
 0x1c1   : > { %2291 = vmatprep.subr.mxu0 %v2713_v0  ;;  %v1512_v26 = vpop.permute.xlu1 %1511 }
 0x1c2   : > { %v1514_v25 = vpop.permute.xlu0 %1513 }
 0x1c3   : > { %2284 = vmatmul.mubr.msk.f32.vlgmr.msra.gmra.mxu0 %vm521_vm2, %v1347_v23 }
 0x1c4   : > { %2292 = vmatpush3.xpose.msk.msra.mxu0 %vm521_vm2, %v1514_v25  ;;  %2293 = vmatprep.mubr.msk.f32.mxu0 %vm2714_vm0, %v2713_v0 }
 0x1c5   : > { %2301 = vmatprep.subr.mxu0 %v2713_v0  ;;  %v1677_v28 = vpop.permute.xlu1 %1676 }
 0x1c6   : > { %v1679_v27 = vpop.permute.xlu0 %1678 }
 0x1c7   : > { %2294 = vmatmul.mubr.msk.f32.vlgmr.msra.gmra.mxu0 %vm521_vm2, %v1512_v26 }
 0x1c8   : > { %2302 = vmatpush3.xpose.msk.msra.mxu0 %vm521_vm2, %v1679_v27  ;;  %2303 = vmatprep.mubr.msk.f32.mxu0 %vm2714_vm0, %v2713_v0 }
 0x1c9   : > { %2311 = vmatprep.subr.mxu0 %v2713_v0  ;;  %v776_v59 = vpop.permute.xlu1 %775 }
 0x1ca   : > { %v611_v29 = vpop.permute.xlu0 %610 }
 0x1cb   : > { %2237 = vmatpush3.msra.mxu1 %v611_v29  ;;  %2304 = vmatmul.mubr.msk.f32.vlgmr.msra.gmra.mxu0 %vm521_vm2, %v1677_v28 }
 0x1cc   : > { %2246 = vmatprep.subr.mxu1 %v2713_v0  ;;  %2319 = vmatprep.mubr.msk.f32.mxu0 %vm2714_vm0, %v2713_v0 }
 0x1ff   : > { %v594_v30 = vpop.f32.mrf.mxu1 }
 0x200   : > { %v599_v31 = vsel %vm598_vm3, %v594_v30, -inf }
 0x201   : > { %600 = vmax.xlane.f32.xlu0 %v599_v31  ;;  %v2235_v32 = vpop.f32.mrf.mxu1 }
 0x273   : > { %v760_v33 = vpop.f32.mrf.mxu0 }
 0x274   : > { %v764_v34 = vsel %vm598_vm3, %v760_v33, -inf }
 0x275   : > { %765 = vmax.xlane.f32.xlu1 %v764_v34  ;;  %v2245_v35 = vpop.f32.mrf.mxu0 }
 0x277   : > { %v925_v36 = vpop.f32.mrf.mxu0 }
 0x278   : > { %v929_v37 = vsel %vm598_vm3, %v925_v36, -inf }
 0x279   : > { %930 = vmax.xlane.f32.xlu0 %v929_v37  ;;  %v2255_v38 = vpop.f32.mrf.mxu0 }
 0x27b   : > { %v1090_v39 = vpop.f32.mrf.mxu0 }
 0x27c   : > { %v1094_v40 = vsel %vm598_vm3, %v1090_v39, -inf }
 0x27d   : > { %1095 = vmax.xlane.f32.xlu0 %v1094_v40  ;;  %v2265_v41 = vpop.f32.mrf.mxu0 }
 0x27f   : > { %v1255_v42 = vpop.f32.mrf.mxu0 }
 0x280   : > { %v1259_v43 = vsel %vm598_vm3, %v1255_v42, -inf }
 0x281   : > { %1260 = vmax.xlane.f32.xlu1 %v1259_v43  ;;  %v2275_v44 = vpop.f32.mrf.mxu0 }
 0x283   : > { %v1420_v45 = vpop.f32.mrf.mxu0 }
 0x284   : > { %v1424_v46 = vsel %vm598_vm3, %v1420_v45, -inf }
 0x285   : > { %1425 = vmax.xlane.f32.xlu0 %v1424_v46  ;;  %v2285_v47 = vpop.f32.mrf.mxu0 }
 0x287   : > { %v1585_v48 = vpop.f32.mrf.mxu0 }
 0x288   : > { %v1589_v49 = vsel %vm598_vm3, %v1585_v48, -inf }
 0x289   : > { %1590 = vmax.xlane.f32.xlu1 %v1589_v49  ;;  %v2295_v50 = vpop.f32.mrf.mxu0 }
 0x28a   : > { %v601_v54 = vpop.xlane.xlu0 %600 }
 0x28b   : > { %v1750_v51 = vpop.f32.mrf.mxu0  ;;  %v602_v55 = vsub.f32 %v594_v30, %v601_v54 }
 0x28c   : > { %v1754_v52 = vsel %vm598_vm3, %v1750_v51, -inf }
 0x28d   : > { %1755 = vmax.xlane.f32.xlu0 %v1754_v52  ;;  %v2305_v53 = vpop.f32.mrf.mxu0  ;;  %v603_v56 = vmul.f32 1.442695, %v602_v55 }
 0x28f   : > { %2446 = vpow2.f32 %v603_v56 }
 0x29a   : > { %1105 = vrot.lane.b32.xlu1 %v2963_v11, %s2724_s9  ;;  %s363_s9 = scalar_lea.vmem [#allocation11], %s2917_s14  ;;  %s2616_s14 = sshll.u32 %s2737_s24, 4  ;;  %s2617_s14 = int_to_ptr.vmem [resolvable:$false] %s2616_s14 }
 0x29c   : > { %v2447_v57 = vpop.eup %2446 }
 0x29d   : > { %v605_v58 = vsel %vm598_vm3, %v2447_v57, 0.0 }
 0x2a3   : > { %940 = vrot.lane.b32.xlu0 %v2963_v11, %s2725_s0  ;;  %s1981_s0 = sshll.u32 %s363_s9, 4  ;;  %s1982_s0 = int_to_ptr.vmem [resolvable:$true] %s1981_s0 }
 0x2a4   : > { %p2619_p11 = scmp.lt.s32.totalorder %s1982_s0, %s2617_s14 }
 0x2be   : > { %606 = vadd.xlane.f32.xlu1 %v605_v58 }
 0x2fe   : > { %v766_v60 = vpop.xlane.xlu1 %765 }
 0x2ff   : > { %v767_v61 = vsub.f32 %v760_v33, %v766_v60 }
 0x301   : > { %v768_v62 = vmul.f32 1.442695, %v767_v61 }
 0x302   : > { %v931_v63 = vpop.xlane.xlu0 %930 }
 0x303   : > { %2448 = vpow2.f32 %v768_v62  ;;  %v932_v1 = vsub.f32 %v925_v36, %v931_v63 }
 0x305   : > { %v933_v2 = vmul.f32 1.442695, %v932_v1 }
 0x306   : > { %v1096_v3 = vpop.xlane.xlu0 %1095 }
 0x307   : > { %2450 = vpow2.f32 %v933_v2  ;;  %v1097_v4 = vsub.f32 %v1090_v39, %v1096_v3 }
 0x309   : > { %v1098_v5 = vmul.f32 1.442695, %v1097_v4 }
 0x30a   : > { %v1261_v13 = vpop.xlane.xlu1 %1260 }
 0x30b   : > { %2452 = vpow2.f32 %v1098_v5  ;;  %v1262_v14 = vsub.f32 %v1255_v42, %v1261_v13 }
 0x30d   : > { %v1263_v18 = vmul.f32 1.442695, %v1262_v14 }
 0x30e   : > { %v1426_v15 = vpop.xlane.xlu0 %1425 }
 0x30f   : > { %v1427_v17 = vsub.f32 %v1420_v45, %v1426_v15  ;;  %2454 = vpow2.f32 %v1263_v18 }
 0x310   : > { %v2449_v6 = vpop.eup %2448 }
 0x311   : > { %v770_v7 = vsel %vm598_vm3, %v2449_v6, 0.0  ;;  %v1428_v21 = vmul.f32 1.442695, %v1427_v17 }
 0x312   : > { %771 = vadd.xlane.f32.xlu0 %v770_v7  ;;  %v1591_v16 = vpop.xlane.xlu1 %1590  ;;  %v1884_v7 = vld [vmem:[#allocation10 + $0x18] sm:$0xff] }
 0x313   : > { %v1592_v19 = vsub.f32 %v1585_v48, %v1591_v16  ;;  %2456 = vpow2.f32 %v1428_v21  ;;  %2312 = vmatpush3.msra.mxu0 %v1884_v7 }
 0x314   : > { %v3028_v8 = vpop.eup %2450  ;;  %2313 = vmatprep.subr.mxu0 %v2713_v0 }
 0x315   : > { %v935_v9 = vsel %vm598_vm3, %v3028_v8, 0.0  ;;  %v1593_v22 = vmul.f32 1.442695, %v1592_v19 }
 0x316   : > { %936 = vadd.xlane.f32.xlu1 %v935_v9  ;;  %v1756_v20 = vpop.xlane.xlu0 %1755  ;;  %v1106_v25 = vpop.permute.xlu1 %1105  ;;  %v1882_v9 = vld [vmem:[#allocation10 + $0x8] sm:$0xff] }
 0x317   : > { %v1757_v23 = vsub.f32 %v1750_v51, %v1756_v20  ;;  %2458 = vpow2.f32 %v1593_v22 }
 0x318   : > { %v3032_v10 = vpop.eup %2452 }
 0x319   : > { %v1100_v12 = vsel %vm598_vm3, %v3032_v10, 0.0  ;;  %v1758_v24 = vmul.f32 1.442695, %v1757_v23 }
 0x31a   : > { %1101 = vadd.xlane.f32.xlu0 %v1100_v12  ;;  %v941_v37 = vpop.permute.xlu0 %940  ;;  %v1881_v12 = vld [vmem:[#allocation10] sm:$0xff] }
 0x31b   : > { %2460 = vpow2.f32 %v1758_v24 }
 0x31c   : > { %v2455_v26 = vpop.eup %2454 }
 0x31d   : > { %v1265_v29 = vsel %vm598_vm3, %v2455_v26, 0.0 }
 0x320   : > { %v3038_v28 = vpop.eup %2456 }
 0x321   : > { %v1430_v32 = vsel %vm598_vm3, %v3038_v28, 0.0 }
 0x324   : > { %v3041_v30 = vpop.eup %2458 }
 0x325   : > { %v1595_v31 = vsel %vm598_vm3, %v3041_v30, 0.0 }
 0x327   : > { %1435 = vrot.lane.b32.xlu1 %v2963_v11, %s2726_s8 }
 0x328   : > { %v3047_v33 = vpop.eup %2460 }
 0x329   : > { %v1760_v34 = vsel %vm598_vm3, %v3047_v33, 0.0 }
 0x330   : > { %1270 = vrot.lane.b32.xlu0 %v2963_v11, %s2727_s11 }
 0x347   : > { %v607_v27 = vpop.xlane.xlu1 %606 }
 0x348   : > { %2462 = vrcp.f32 %v607_v27 }
 0x34b   : > { %1266 = vadd.xlane.f32.xlu1 %v1265_v29 }
 0x34f   : > { %1596 = vadd.xlane.f32.xlu1 %v1595_v31  ;;  %1431 = vadd.xlane.f32.xlu0 %v1430_v32 }
 0x353   : > { %1761 = vadd.xlane.f32.xlu1 %v1760_v34 }
 0x355   : > { %v2463_v35 = vpop.eup %2462 }
 0x356   : > { %v609_v36 = vmul.f32 %v2463_v35, %v2447_v57 }
 0x358   : > { %2239 = vmatmul.mubr.msk.f32.vlgmr.msra.gmra.mxu1 %vm598_vm3, %v609_v36 }
 0x359   : > { %2247 = vmatpush3.msra.mxu1 %v776_v59  ;;  %2248 = vmatprep.mubr.msk.f32.mxu1 %vm2714_vm0, %v2713_v0 }
 0x35a   : > { %2256 = vmatprep.subr.mxu1 %v2713_v0 }
 0x364   : > { %1765 = vrot.lane.b32.xlu1 %v2963_v11, %s2728_s7  ;;  %s3100_s7 = scalar_lea.hbm %s3149_s6, %s2159_s28 }
 0x365   : > { %1600 = vrot.lane.b32.xlu0 %v2963_v11, %s2729_s13  ;;  %s1967_s13 = scalar_lea.sflag [#allocation4], %s2914_s4 }
 0x39b   : > { %v772_v38 = vpop.xlane.xlu0 %771 }
 0x39c   : > { %2464 = vrcp.f32 %v772_v38 }
 0x39f   : > { %v937_v39 = vpop.xlane.xlu1 %936 }
 0x3a0   : > { %2466 = vrcp.f32 %v937_v39 }
 0x3a3   : > { %v1102_v40 = vpop.xlane.xlu0 %1101  ;;  %v1436_v47 = vpop.permute.xlu1 %1435 }
 0x3a4   : > { %2468 = vrcp.f32 %v1102_v40 }
 0x3a7   : > { %v1271_v46 = vpop.permute.xlu0 %1270 }
 0x3a9   : > { %v2465_v41 = vpop.eup %2464 }
 0x3aa   : > { %v774_v42 = vmul.f32 %v2465_v41, %v2449_v6 }
 0x3ac   : > { %2249 = vmatmul.mubr.msk.f32.vlgmr.msra.gmra.mxu1 %vm598_vm3, %v774_v42 }
 0x3ad   : > { %v2467_v43 = vpop.eup %2466  ;;  %2257 = vmatpush3.msra.mxu1 %v941_v37  ;;  %2258 = vmatprep.mubr.msk.f32.mxu1 %vm2714_vm0, %v2713_v0 }
 0x3ae   : > { %2266 = vmatprep.subr.mxu1 %v2713_v0  ;;  %v939_v11 = vmul.f32 %v2467_v43, %v3028_v8  ;;  %v1883_v8 = vld [vmem:[#allocation10 + $0x10] sm:$0xff] }
 0x3af   : > { %2314 = vmatpush3.msra.mxu0 %v1883_v8 }
 0x3b0   : > { %2259 = vmatmul.mubr.msk.f32.vlgmr.msra.gmra.mxu1 %vm598_vm3, %v939_v11  ;;  %2315 = vmatprep.subr.mxu0 %v2713_v0 }
 0x3b1   : > { %v2469_v44 = vpop.eup %2468  ;;  %2267 = vmatpush3.msra.mxu1 %v1106_v25  ;;  %2268 = vmatprep.mubr.msk.f32.mxu1 %vm2714_vm0, %v2713_v0 }
 0x3b2   : > { %2276 = vmatprep.subr.mxu1 %v2713_v0  ;;  %v1104_v45 = vmul.f32 %v2469_v44, %v3032_v10  ;;  %2316 = vmatpush3.msra.mxu0 %v1882_v9 }
 0x3b3   : > { %2317 = vmatprep.subr.mxu0 %v2713_v0 }
 0x3b4   : > { %2269 = vmatmul.mubr.msk.f32.vlgmr.msra.gmra.mxu1 %vm598_vm3, %v1104_v45  ;;  %2318 = vmatpush3.msra.mxu0 %v1881_v12 }
 0x3b5   : > { %2277 = vmatpush3.msra.mxu1 %v1271_v46  ;;  %2278 = vmatprep.mubr.msk.f32.mxu1 %vm2714_vm0, %v2713_v0 }
 0x3b6   : > { %2286 = vmatprep.subr.mxu1 %v2713_v0 }
 0x3d4   : > { %v1267_v48 = vpop.xlane.xlu1 %1266 }
 0x3d5   : > { %2470 = vrcp.f32 %v1267_v48 }
 0x3d8   : > { %v1597_v49 = vpop.xlane.xlu1 %1596  ;;  %v1432_v50 = vpop.xlane.xlu0 %1431 }
 0x3d9   : > { %2472 = vrcp.f32 %v1432_v50 }
 0x3da   : > { %2474 = vrcp.f32 %v1597_v49 }
 0x3dc   : > { %v1762_v51 = vpop.xlane.xlu1 %1761  ;;  %v1601_v57 = vpop.permute.xlu0 %1600 }
 0x3dd   : > { %2476 = vrcp.f32 %v1762_v51 }
 0x3e0   : > { %v1766_v60 = vpop.permute.xlu1 %1765 }
 0x3e2   : > { %v2471_v52 = vpop.eup %2470 }
 0x3e3   : > { %v1269_v53 = vmul.f32 %v2471_v52, %v2455_v26 }
 0x3e5   : > { %2279 = vmatmul.mubr.msk.f32.vlgmr.msra.gmra.mxu1 %vm598_vm3, %v1269_v53 }
 0x3e6   : > { %2287 = vmatpush3.msra.mxu1 %v1436_v47  ;;  %2288 = vmatprep.mubr.msk.f32.mxu1 %vm2714_vm0, %v2713_v0  ;;  %v2473_v54 = vpop.eup %2472 }
 0x3e7   : > { %2296 = vmatprep.subr.mxu1 %v2713_v0  ;;  %v1434_v55 = vmul.f32 %v2473_v54, %v3038_v28  ;;  %v2475_v56 = vpop.eup %2474 }
 0x3e8   : > { %v1599_v58 = vmul.f32 %v2475_v56, %v3041_v30 }
 0x3e9   : > { %2289 = vmatmul.mubr.msk.f32.vlgmr.msra.gmra.mxu1 %vm598_vm3, %v1434_v55 }
 0x3ea   : > { %2297 = vmatpush3.msra.mxu1 %v1601_v57  ;;  %2298 = vmatprep.mubr.msk.f32.mxu1 %vm2714_vm0, %v2713_v0  ;;  %v2477_v59 = vpop.eup %2476 }
 0x3eb   : > { %2306 = vmatprep.subr.mxu1 %v2713_v0  ;;  %v1764_v61 = vmul.f32 %v2477_v59, %v3047_v33  ;;  %v2156_v33 = vld [vmem:[%s3148_s5] ss:$0 sm:$0xff] }
 0x3ed   : > { %2299 = vmatmul.mubr.msk.f32.vlgmr.msra.gmra.mxu1 %vm598_vm3, %v1599_v58 }
 0x3ee   : > { %2307 = vmatpush3.msra.mxu1 %v1766_v60  ;;  %2308 = vmatprep.mubr.msk.f32.mxu1 %vm2714_vm0, %v2713_v0 }
 0x3f1   : > { %2309 = vmatmul.mubr.msk.f32.vlgmr.msra.gmra.mxu1 %vm598_vm3, %v1764_v61 }
 0x418   : > { %v682_v62 = vpop.f32.mrf.mxu1 }
 0x41a   : > { %v2240_v63 = vpop.f32.mrf.mxu1 }
 0x46c   : > { %v847_v1 = vpop.f32.mrf.mxu1 }
 0x46d   : > { %1842 = vrot.lane.b32.xlu0 %v847_v1, %s2730_s19  ;;  %s2612_s19 = scalar_lea.vmem %s1982_s0, 128 }
 0x46e   : > { %v2250_v2 = vpop.f32.mrf.mxu1  ;;  %p2613_p0 = scmp.ne.s32.totalorder %s1982_s0, %s2612_s19 }
 0x470   : > { %v1012_v3 = vpop.f32.mrf.mxu1  ;;  %p2614_p3 = pnand %p2613_p0, %p2869_p5 }
 0x471   : > { %1846 = vrot.lane.b32.xlu1 %v1012_v3, %s2731_s27  ;;  %s2618_s27 = scalar_lea.vmem %s2617_s14, 256 }
 0x472   : > { %v2260_v4 = vpop.f32.mrf.mxu1  ;;  %p2615_p10 = pneg %p2614_p3  ;;  %p2620_p9 = scmp.lt.s32.totalorder %s2618_s27, %s2612_s19 }
 0x474   : > { %v1177_v5 = vpop.f32.mrf.mxu1  ;;  %p2621_p13 = por %p2620_p9, %p2619_p11 }
 0x475   : > { %1850 = vrot.lane.b32.xlu0 %v1177_v5, %s2732_s29 }
 0x476   : > { %v2270_v6 = vpop.f32.mrf.mxu1  ;;  %p2622_p2 = pnand %p2621_p13, %p2615_p10 }
 0x4a5   : > { %v1342_v10 = vpop.f32.mrf.mxu1 }
 0x4a6   : > { %1854 = vrot.lane.b32.xlu1 %v1342_v10, %s2733_s12 }
 0x4a7   : > { %v2280_v13 = vpop.f32.mrf.mxu1 }
 0x4a9   : > { %v1507_v14 = vpop.f32.mrf.mxu1 }
 0x4aa   : > { %1858 = vrot.lane.b32.xlu0 %v1507_v14, %s2734_s20 }
 0x4ab   : > { %v2290_v15 = vpop.f32.mrf.mxu1 }
 0x4ad   : > { %v1672_v16 = vpop.f32.mrf.mxu1 }
 0x4ae   : > { %1862 = vrot.lane.b32.xlu1 %v1672_v16, %s2735_s2 }
 0x4af   : > { %v2300_v17 = vpop.f32.mrf.mxu1 }
 0x4b1   : > { %v1837_v18 = vpop.f32.mrf.mxu1 }
 0x4b2   : > { %1866 = vrot.lane.b32.xlu0 %v1837_v18, %s2736_s3 }
 0x4b3   : > { %v2310_v19 = vpop.f32.mrf.mxu1 }
 0x4df   : > { %v1843_v20 = vpop.permute.xlu0 %1842 }
 0x4e0   : > { %v1869_v0 = vsel %vm521_vm2, %v682_v62, %v1843_v20 }
 0x4e3   : > { %v1847_v21 = vpop.permute.xlu1 %1846 }
 0x4e4   : > { %v1870_v24 = vsel %vm598_vm3, %v1869_v0, %v1847_v21 }
 0x4e7   : > { %v1851_v22 = vpop.permute.xlu0 %1850 }
 0x4e8   : > { %v1872_v26 = vsel %vm1871_vm4, %v1870_v24, %v1851_v22 }
 0x518   : > { %v1855_v23 = vpop.permute.xlu1 %1854 }
 0x519   : > { %v1874_v28 = vsel %vm1873_vm5, %v1872_v26, %v1855_v23 }
 0x51c   : > { %v1859_v25 = vpop.permute.xlu0 %1858 }
 0x51d   : > { %v1876_v29 = vsel %vm1875_vm6, %v1874_v28, %v1859_v25 }
 0x520   : > { %v1863_v27 = vpop.permute.xlu1 %1862 }
 0x521   : > { %v1878_v30 = vsel %vm1877_vm7, %v1876_v29, %v1863_v27 }
 0x524   : > { %v1867_v31 = vpop.permute.xlu0 %1866 }
 0x525   : > { %v1880_v32 = vsel %vm1879_vm8, %v1878_v30, %v1867_v31 }
 0x526   : > { %2320 = vmatmul.mubr.msk.f32.vlgmr.msra.gmra.mxu0 %vm370_vm1, %v1880_v32 }
 0x5e6   : > { %v1961_v34 = vpop.f32.mrf.mxu0 }
 0x5e7   : > { %v1962_v35 = vadd.f32 %v2156_v33, %v1961_v34 }
 0x5e8   : > { %v2321_v36 = vpop.f32.mrf.mxu0 }
 0x5e9   : > { %1965 = vst.msk [vmem:[%s363_s9] sm:$0xff] %vm370_vm1, %v1962_v35 }
 0x5ea   : > { %2625 = shalt.err (!%p2622_p2)
}
 0x5eb   : > { %s2626_s29 = scalar_lea.hbm %s3100_s7, 128  ;;  %s2630_s20 = scalar_lea.hbm %s3149_s6, 256 }
 0x5ec   : > { %p2627_p4 = scmp.ne.s32.totalorder %s3100_s7, %s2626_s29  ;;  %p2631_p7 = scmp.lt.s32.totalorder %s3100_s7, %s3149_s6 }
 0x5ed   : > { %p2632_p6 = scmp.lt.s32.totalorder %s2630_s20, %s2626_s29 }
 0x5ee   : > { %p2628_p1 = pnand %p2627_p4, %p2869_p5 }
 0x5ef   : > { %p2633_p12 = por %p2632_p6, %p2631_p7 }
 0x5f0   : > { %p2629_p8 = pneg %p2628_p1 }
 0x5f2   : > { %p2634_p0 = pnand %p2633_p12, %p2629_p8 }
 0x5f4   : > { %2637 = shalt.err (!%p2634_p0)
}
 0x5f5   : > { %2338 = dma.vmem_to_hbm [thread:$0]  (%p2869_p5), %s1982_s0, 128, %s3100_s7, %s1967_s13  }
 0x5f6 PF: > { %s1993_s18 = sand.u32 1, %s2684_s21   ;;  %p3172_p3 = scmp.ne.s32.totalorder %s3157_s30, 0 }
 0x5f7   : > { %p3173_p10 = scmp.ge.s32.totalorder %s2704_s26, 2  ;;  %s1994_s16 = scalar_lea.sflag [#allocation4], %s1993_s18 }
 0x5f9   : > { %p2358_p11 = pnand %p3173_p10, %p3172_p3 }
 0x5fb   : > { %p2359_p9 = pneg %p2358_p11 }
 0x5fd   : > { %2679 = dma.done.wait (%p2359_p9), %s1994_s16, 128  }
 0x5fe   : > { %2681 = vsyncadd (%p2359_p9), %s1994_s16, 4294967168  ;;  %s26_s26 = sadd.s32 1, %s2704_s26   ;;  %s3174_s21 = smov %s2688_s22 }
 0x5ff   : > { %p23_p13 = scmp.ge.s32.totalorder %s26_s26, 4   ;;  %s3175_s22 = smov %s2692_s23 }
 0x600   : > { %s3176_s23 = smov %s2881_s17  ;;  %s3177_s24 = smov %s2700_s25 }
 0x601   : > { %s3178_s25 = smov %s3180_s15  ;;  %25 = sbr.rel (!%p23_p13) target bundleno = 14 (0xe), region = 114 }
 0x606   :  { %1999 = vsyncpa [#allocation3], 1 }
 0x607   :  { %2001 = vsyncpa [#allocation3 + $0x1], 1 }
 0x608   :  { %2002 = vsyncpa [#allocation6], 1 }
 0x609   :  { %2004 = vsyncpa [#allocation6 + $0x1], 1 }
 0x60a   :  { %2005 = vsyncpa [#allocation9], 1 }
 0x60b   :  { %2006 = vsyncpa [#allocation4], 1 }
 0x60c   :  { %2008 = vsyncpa [#allocation4 + $0x1], 1 }

</bundles_post_ra>
